<compile_context>
chip_gen: v5e
topology: v5e:2x2
jax: 0.10.0
libtpu: 0.0.40
codegen_flags: <defaults>
</compile_context>

<pallas_src>
import functools

import jax
import jax.numpy as jnp
from jax.experimental import pallas as pl
from jax.experimental.pallas import tpu as pltpu


# ----------------------------------------------------------------------------
# Kernels (specialized on bias presence; shared K-reduction accumulator form).
# ----------------------------------------------------------------------------
def _linear_clamped_bias_kernel(x_ref, w_ref, b_ref, o_ref, acc_ref):
    # x_ref: (tm, tk), w_ref: (tk, tn), b_ref: (1, tn) f32,
    # o_ref: (tm, tn), acc_ref: (tm, tn) f32 scratch.
    k = pl.program_id(2)

    @pl.when(k == 0)
    def _():
        acc_ref[...] = jnp.zeros_like(acc_ref)

    x = x_ref[...]
    if x.dtype != w_ref.dtype:            # static (trace-time) dtype check
        x = x.astype(w_ref.dtype)
    acc_ref[...] += jnp.dot(x, w_ref[...], preferred_element_type=jnp.float32)

    @pl.when(k == pl.num_programs(2) - 1)
    def _():
        o_ref[...] = (acc_ref[...] + b_ref[...]).astype(o_ref.dtype)


def _linear_clamped_nobias_kernel(x_ref, w_ref, o_ref, acc_ref):
    k = pl.program_id(2)

    @pl.when(k == 0)
    def _():
        acc_ref[...] = jnp.zeros_like(acc_ref)

    x = x_ref[...]
    if x.dtype != w_ref.dtype:
        x = x.astype(w_ref.dtype)
    acc_ref[...] += jnp.dot(x, w_ref[...], preferred_element_type=jnp.float32)

    @pl.when(k == pl.num_programs(2) - 1)
    def _():
        o_ref[...] = acc_ref[...].astype(o_ref.dtype)


# ----------------------------------------------------------------------------
# Host-side helpers.
# ----------------------------------------------------------------------------
def _round_up(x, m):
    return ((x + m - 1) // m) * m


def _vmem_capacity_bytes():
    try:
        return int(pltpu.get_tpu_info().vmem_capacity_bytes)
    except Exception:
        return 64 << 20  # smallest current generation (v7x per-TC): safe everywhere


def _choose_tiles(B, K, N_pad, x_bytes, w_bytes, out_bytes, capacity):
    """Pick (tm, tn, tk) from the real VMEM budget of this TPU generation."""
    budget = int(capacity * 0.55)          # headroom for compiler scratch
    big_vmem = capacity >= (96 << 20)      # v5e / v6e (128 MiB) vs v7x (64 MiB)
    tm_cap = 512 if big_vmem else 256
    tn_cap = 512 if big_vmem else 256

    tm = min(tm_cap, _round_up(B, 8))
    tn = min(tn_cap, N_pad)

    # If a single tile would cover the whole problem, split N so both v7x
    # TensorCores get a "parallel" tile (harmless on single-TC chips).
    if B <= tm and N_pad <= tn and N_pad >= 256:
        tn = _round_up(pl.cdiv(N_pad, 2), 128)

    def fits(tm_, tn_, tk_):
        need = (2 * tm_ * tk_ * x_bytes        # x tiles (double-buffered)
                + 2 * tk_ * tn_ * w_bytes      # W tiles (double-buffered)
                + 2 * tn_ * 4                  # bias tiles (f32)
                + 2 * tm_ * tn_ * out_bytes    # out tiles (double-buffered)
                + tm_ * tn_ * 4)               # f32 accumulator scratch
        return need <= budget

    tk = K
    # Shrink M/N tiles first: keeps K un-tiled so x never needs padding.
    while not fits(tm, tn, tk) and (tm > 8 or tn > 128):
        if tm >= tn and tm > 8:
            tm = max(8, _round_up(tm // 2, 8))
        elif tn > 128:
            tn = max(128, _round_up(tn // 2, 128))
        else:
            break
    # Still over budget (huge in_features): tile the contraction dim.
    if not fits(tm, tn, tk):
        tk = 512
        while not fits(tm, tn, tk) and tk > 128:
            tk //= 2
    return tm, tn, tk


def prepare_linear_clamped_params(weights, bias_values=None, dtype=jnp.float32):
    """One-time preparation of the fixed ('clamped') parameters.

    weights:     (out_features, in_features) -- PyTorch layout
    bias_values: (out_features,) or None
    dtype:       storage/compute dtype of W (use jnp.bfloat16 to halve W HBM
                 traffic and hit the native bf16 MXU rate; accumulation is f32)

    Returns a dict:
      wt:           (in_features, N_pad) weight, transposed, N padded to 128
      bias:         (1, N_pad) float32, or None
      out_features: original out_features (for slicing the padded output)
    """
    w = jnp.asarray(weights, dtype=dtype)          # (N, K)
    n, _k = w.shape
    n_pad = _round_up(n, 128)
    wt = w.T                                       # (K, N), done once
    if n_pad != n:
        wt = jnp.pad(wt, ((0, 0), (0, n_pad - n)))
    bias = None
    if bias_values is not None:
        b = jnp.asarray(bias_values, dtype=jnp.float32).reshape(1, n)
        if n_pad != n:
            b = jnp.pad(b, ((0, 0), (0, n_pad - n)))
        bias = b
    return {"wt": wt, "bias": bias, "out_features": n}


@functools.partial(jax.jit, static_argnames=("out_features",))
def _linear_clamped_forward_2d(x, wt, bias, out_features):
    """x: (B, K); wt: (K, N_pad); bias: (1, N_pad) f32 or None."""
    B, K = x.shape
    K_w, N_pad = wt.shape
    assert K == K_w, "in_features mismatch between input and clamped weight"
    out_dtype = x.dtype

    capacity = _vmem_capacity_bytes()
    tm, tn, tk = _choose_tiles(
        B, K, N_pad,
        jnp.dtype(x.dtype).itemsize, jnp.dtype(wt.dtype).itemsize,
        jnp.dtype(out_dtype).itemsize, capacity)

    # Rare huge-in_features path: pad K so the reduction tiles divide it
    # exactly (zero padding keeps the accumulation exact).
    if tk < K and K % tk != 0:
        k_pad = _round_up(K, tk)
        x = jnp.pad(x, ((0, 0), (0, k_pad - K)))
        wt = jnp.pad(wt, ((0, k_pad - K), (0, 0)))
        K = k_pad

    grid = (pl.cdiv(B, tm), pl.cdiv(N_pad, tn), pl.cdiv(K, tk))

    in_specs = [
        pl.BlockSpec((tm, tk), lambda i, j, k: (i, k)),   # x row/K tile
        pl.BlockSpec((tk, tn), lambda i, j, k: (k, j)),   # W tile (already (K,N))
    ]
    args = [x, wt]
    if bias is not None:
        in_specs.append(pl.BlockSpec((1, tn), lambda i, j, k: (0, j)))
        args.append(bias)
        kernel = _linear_clamped_bias_kernel
    else:
        kernel = _linear_clamped_nobias_kernel

    # Request only what the chosen tiles need (plus headroom), capped at the
    # physical capacity of this generation.
    need = (2 * tm * tk * jnp.dtype(x.dtype).itemsize
            + 2 * tk * tn * jnp.dtype(wt.dtype).itemsize
            + 2 * tn * 4
            + 2 * tm * tn * jnp.dtype(out_dtype).itemsize
            + tm * tn * 4)
    vmem_limit = int(min(capacity, max(32 << 20, 2 * need + (2 << 20))))

    out = pl.pallas_call(
        kernel,
        out_shape=jax.ShapeDtypeStruct((B, N_pad), out_dtype),
        grid_spec=pltpu.PrefetchScalarGridSpec(
            num_scalar_prefetch=0,
            grid=grid,
            in_specs=in_specs,
            out_specs=pl.BlockSpec((tm, tn), lambda i, j, k: (i, j)),
            scratch_shapes=[pltpu.VMEM((tm, tn), jnp.float32)],
        ),
        compiler_params=pltpu.CompilerParams(
            dimension_semantics=("parallel", "parallel", "arbitrary"),
            vmem_limit_bytes=vmem_limit,
        ),
    )(*args)

    # Slice only the axis that was actually padded (N); B is never padded.
    if N_pad != out_features:
        out = out[:, :out_features]
    return out


def linear_clamped_forward(x, params):
    """Pallas implementation of LinearClamped.forward.

    x:      (..., in_features) or (in_features,)
    params: dict from prepare_linear_clamped_params
    """
    wt, bias, n = params["wt"], params["bias"], params["out_features"]
    if x.ndim == 1:
        # PyTorch: F.linear(input.view(1, -1), ...) -> result stays 2-D.
        x2 = x.reshape(1, -1)
        lead = (1,)
    else:
        lead = x.shape[:-1]
        x2 = x.reshape(-1, x.shape[-1])
    out = _linear_clamped_forward_2d(x2, wt, bias, out_features=n)
    return out.reshape(lead + (n,))


# ----------------------------------------------------------------------------
# Demo / correctness check.
# ----------------------------------------------------------------------------
if __name__ == "__main__":
    key = jax.random.PRNGKey(0)
    k_x, k_w, k_b, k_x2, k_x3 = jax.random.split(key, 5)

    batch, in_features, out_features = 8, 32, 16

    x = jax.random.normal(k_x, (batch, in_features), dtype=jnp.float32)
    weight_raw = jax.random.normal(k_w, (out_features, in_features), dtype=jnp.float32)
    bias_raw = jax.random.normal(k_b, (out_features,), dtype=jnp.float32)

    # Fixed ("clamped") parameters: transposed / padded / cast ONCE.
    params = prepare_linear_clamped_params(weight_raw, bias_raw)
    params_nobias = prepare_linear_clamped_params(weight_raw, None)
    params_bf16 = prepare_linear_clamped_params(weight_raw, bias_raw, dtype=jnp.bfloat16)

    # 2-D input path.
    y = jax.block_until_ready(linear_clamped_forward(x, params))
    ref = x @ weight_raw.T + bias_raw
    assert y.shape == (batch, out_features)
    assert jnp.allclose(y, ref, atol=1e-5, rtol=1e-5), "2-D path mismatch"

    # 1-D input path (PyTorch keeps the result 2-D).
    y1 = jax.block_until_ready(linear_clamped_forward(x[0], params))
    assert y1.shape == (1, out_features)
    assert jnp.allclose(y1, ref[:1], atol=1e-5, rtol=1e-5), "1-D path mismatch"

    # No-bias path (specialized kernel, no bias DMA / add).
    ynb = jax.block_until_ready(linear_clamped_forward(x, params_nobias))
    assert jnp.allclose(ynb, x @ weight_raw.T, atol=1e-5, rtol=1e-5), "no-bias mismatch"

    # N-D input path (leading batch dims flattened and restored).
    x3 = jax.random.normal(k_x3, (2, 5, in_features), dtype=jnp.float32)
    y3 = jax.block_until_ready(linear_clamped_forward(x3, params))
    ref3 = jnp.einsum("bsd,nd->bsn", x3, weight_raw) + bias_raw
    assert y3.shape == (2, 5, out_features)
    assert jnp.allclose(y3, ref3, atol=1e-5, rtol=1e-5), "N-D path mismatch"

    # Larger batch: exercises the ragged cdiv grid (no batch padding).
    big = 320
    x2 = jax.random.normal(k_x2, (big, in_features), dtype=jnp.float32)
    y2 = jax.block_until_ready(linear_clamped_forward(x2, params))
    ref2 = x2 @ weight_raw.T + bias_raw
    assert y2.shape == (big, out_features)
    assert jnp.allclose(y2, ref2, atol=1e-5, rtol=1e-5), "tiled path mismatch"

    # Opt-in bf16-stored weights (half the W HBM traffic, f32 accumulation).
    ybf = jax.block_until_ready(linear_clamped_forward(x, params_bf16))
    assert ybf.shape == (batch, out_features)
    assert jnp.allclose(ybf, ref, atol=0.25, rtol=0.05), "bf16-weight path mismatch"

    # TODO(synk): optional fp8 (v7x) / int8 (v5e/v6e) weight quantization with a
    # per-channel scale fused into the bias epilogue is left out (accuracy opt-in).

    print("KERNEL_OK")
</pallas_src>

<mosaic_0001>
module attributes {stable_mosaic.version = 11 : i64} {
  func.func @_linear_clamped_bias_kernel(%arg0: i32, %arg1: i32, %arg2: i32, %arg3: memref<8x32xf32, #tpu.memory_space<vmem>>, %arg4: memref<32x128xf32, #tpu.memory_space<vmem>>, %arg5: memref<1x128xf32, #tpu.memory_space<vmem>>, %arg6: memref<8x128xf32, #tpu.memory_space<vmem>>, %arg7: memref<8x128xf32, #tpu.memory_space<vmem>>) attributes {dimension_semantics = [#tpu.dimension_semantics<parallel>, #tpu.dimension_semantics<parallel>, #tpu.dimension_semantics<arbitrary>], iteration_bounds = array<i64: 1, 1, 1>, scalar_prefetch = 0 : i64, scratch_operands = 1 : i64, tpu.core_type = #tpu.core_type<tc>, window_params = [{transform_indices = @transform_0, window_bounds = array<i64: 8, 32>}, {transform_indices = @transform_1, window_bounds = array<i64: 32, 128>}, {transform_indices = @transform_2, window_bounds = array<i64: 1, 128>}, {transform_indices = @transform_3, window_bounds = array<i64: 8, 128>}]} {
    %c0_i32 = arith.constant 0 : i32
    %0 = arith.cmpi eq, %arg2, %c0_i32 : i32
    %1 = arith.extui %0 : i1 to i32
    %c0_i32_0 = arith.constant 0 : i32
    %2 = arith.cmpi ne, %1, %c0_i32_0 : i32
    scf.if %2 {
      %cst_10 = arith.constant 0.000000e+00 : f32
      %12 = vector.broadcast %cst_10 : f32 to vector<8x128xf32>
      %c0_11 = arith.constant 0 : index
      %c0_12 = arith.constant 0 : index
      %13 = vector.load %arg7[%c0_11, %c0_12] : memref<8x128xf32, #tpu.memory_space<vmem>>, vector<8x128xf32>
      tpu.vector_store %arg7[%c0_11, %c0_12], %12 {strides = array<i32>} : memref<8x128xf32, #tpu.memory_space<vmem>>, vector<8x128xf32>,
    } else {
    }
    %c0 = arith.constant 0 : index
    %c0_1 = arith.constant 0 : index
    %3 = vector.load %arg3[%c0, %c0_1] : memref<8x32xf32, #tpu.memory_space<vmem>>, vector<8x32xf32>
    %c0_2 = arith.constant 0 : index
    %c0_3 = arith.constant 0 : index
    %4 = vector.load %arg7[%c0_2, %c0_3] : memref<8x128xf32, #tpu.memory_space<vmem>>, vector<8x128xf32>
    %c0_4 = arith.constant 0 : index
    %c0_5 = arith.constant 0 : index
    %5 = vector.load %arg4[%c0_4, %c0_5] : memref<32x128xf32, #tpu.memory_space<vmem>>, vector<32x128xf32>
    %cst = arith.constant dense<0.000000e+00> : vector<8x128xf32>
    %6 = tpu.matmul %3, %5, %cst {dimension_numbers = #tpu.dot_dimension_numbers<[1], [0], [0], [1], [0, 0, 1, 1], [], []>} : vector<8x32xf32>, vector<32x128xf32>, vector<8x128xf32> -> vector<8x128xf32>
    %7 = arith.addf %4, %6 : vector<8x128xf32>
    %c0_6 = arith.constant 0 : index
    %c0_7 = arith.constant 0 : index
    %8 = vector.load %arg7[%c0_6, %c0_7] : memref<8x128xf32, #tpu.memory_space<vmem>>, vector<8x128xf32>
    tpu.vector_store %arg7[%c0_6, %c0_7], %7 {strides = array<i32>} : memref<8x128xf32, #tpu.memory_space<vmem>>, vector<8x128xf32>,
    %c0_i32_8 = arith.constant 0 : i32
    %9 = arith.cmpi eq, %arg2, %c0_i32_8 : i32
    %10 = arith.extui %9 : i1 to i32
    %c0_i32_9 = arith.constant 0 : i32
    %11 = arith.cmpi ne, %10, %c0_i32_9 : i32
    scf.if %11 {
      %c0_10 = arith.constant 0 : index
      %c0_11 = arith.constant 0 : index
      %12 = vector.load %arg7[%c0_10, %c0_11] : memref<8x128xf32, #tpu.memory_space<vmem>>, vector<8x128xf32>
      %c0_12 = arith.constant 0 : index
      %c0_13 = arith.constant 0 : index
      %13 = vector.load %arg5[%c0_12, %c0_13] : memref<1x128xf32, #tpu.memory_space<vmem>>, vector<1x128xf32>
      %14 = vector.broadcast %13 : vector<1x128xf32> to vector<8x128xf32>
      %15 = arith.addf %12, %14 : vector<8x128xf32>
      %c0_14 = arith.constant 0 : index
      %c0_15 = arith.constant 0 : index
      %16 = vector.load %arg6[%c0_14, %c0_15] : memref<8x128xf32, #tpu.memory_space<vmem>>, vector<8x128xf32>
      tpu.vector_store %arg6[%c0_14, %c0_15], %15 {strides = array<i32>} : memref<8x128xf32, #tpu.memory_space<vmem>>, vector<8x128xf32>,
    } else {
    }
    return
  }
  func.func @transform_0(%arg0: i32, %arg1: i32, %arg2: i32) -> (i32, i32) {
    %c0_i32 = arith.constant 0 : i32
    return %arg0, %arg2 : i32, i32
  }
  func.func @transform_1(%arg0: i32, %arg1: i32, %arg2: i32) -> (i32, i32) {
    %c0_i32 = arith.constant 0 : i32
    return %arg2, %arg1 : i32, i32
  }
  func.func @transform_2(%arg0: i32, %arg1: i32, %arg2: i32) -> (i32, i32) {
    %c0_i32 = arith.constant 0 : i32
    %c0_i32_0 = arith.constant 0 : i32
    return %c0_i32, %arg1 : i32, i32
  }
  func.func @transform_3(%arg0: i32, %arg1: i32, %arg2: i32) -> (i32, i32) {
    %c0_i32 = arith.constant 0 : i32
    return %arg0, %arg1 : i32, i32
  }
}

</mosaic_0001>

<bundles_post_ra>
// kernel: _linear_clamped_forward_2d.1
= control target key start
LH: loop header
LB: loop body
LE: loop exit
PB: predicated region body
PF: predicated region fallthrough
CT: control target
= control target key end

     0   :  { %8 = vsyncpa [#allocation4], 0  ;;  %s232_s0 = inlined_call_operand.hbm [shape: f32[8,32], index: 0, kind: input, shape index: {}]   ;;  %s233_s1 = inlined_call_operand.hbm [shape: f32[32,128], index: 1, kind: input, shape index: {}]   ;;  %s234_s2 = inlined_call_operand.vmem [shape: f32[1,128], index: 2, kind: input, shape index: {}]   ;;  %s235_s3 = inlined_call_operand.hbm [shape: f32[8,128], index: 3, kind: output, shape index: {}]  }
   0x1   :  { %9 = vsyncpa [#allocation7], 0 }
   0x2   :  { %10 = vsyncpa [#allocation5], 0  ;;  %s16_s14 = sshll.u32 %s232_s0, 4  ;;  %s195_s15 = smov [#allocation3]   ;;  %s17_s14 = int_to_ptr.hbm [resolvable:$true] %s16_s14 }
   0x3   :  { %s18_s16 = sshll.u32 %s195_s15, 4  ;;  %s26_s19 = sshll.u32 %s233_s1, 4  ;;  %s19_s16 = int_to_ptr.vmem [resolvable:$true] %s18_s16  ;;  %s27_s19 = int_to_ptr.hbm [resolvable:$true] %s26_s19 }
   0x4   :  { %21 = dma.hbm_to_vmem [thread:$0]  %s17_s14, 128, %s19_s16, [#allocation4]  }
   0x5   :  { %s196_s20 = smov [#allocation6]   ;;  %s197_s22 = smov 128  }
   0x6   :  { %s28_s21 = sshll.u32 %s196_s20, 4  ;;  %s198_s23 = smov 8   ;;  %s29_s21 = int_to_ptr.vmem [resolvable:$true] %s28_s21 }
   0x7   :  { %34 = dma.hbm_to_vmem [thread:$0]  %s27_s19, 512, %s29_s21, [#allocation7], %s197_s22, %s197_s22, %s198_s23  }
   0x8   :  { %189 = dma.done.wait [#allocation4], 128  }
   0x9   :  { %190 = vsyncadd [#allocation4], 4294967168 }
   0xa   :  { %191 = dma.done.wait [#allocation7], 512  }
   0xb   :  { %192 = vsyncadd [#allocation7], 4294966784  ;;  %v55_v0 = vld [vmem:[#allocation6 + $0x18] sm:$0xff]  ;;  %v54_v1 = vld [vmem:[#allocation6 + $0x10] sm:$0xff]  ;;  %vm56_vm0 = vcmask 261120   ;;  %s199_s24 = smov [#allocation8]  }
   0xc   :  { %72 = vmatpush.msra.mxu0 %v55_v0  ;;  %v53_v2 = vld [vmem:[#allocation6 + $0x8] sm:$0xff]  ;;  %v52_v3 = vld [vmem:[#allocation6] sm:$0xff]  ;;  %v50_v4 = vld [vmem:[#allocation3] sm:$0xff]  ;;  %s97_s25 = sshll.u32 %s199_s24, 4  ;;  %s99_s28 = sshll.u32 %s235_s3, 4  ;;  %s98_s25 = int_to_ptr.vmem [resolvable:$true] %s97_s25  ;;  %s100_s28 = int_to_ptr.hbm [resolvable:$true] %s99_s28 }
   0xd   :  { %v116_v5 = vld [vmem:[%s234_s2] ss:$0 sm:$0xff] }
   0xe   :  { %73 = vmatpush.msra.mxu0 %v54_v1 }
  0x10   :  { %74 = vmatpush.msra.mxu0 %v53_v2 }
  0x12   :  { %75 = vmatpush.msra.mxu0 %v52_v3 }
  0x13   :  { %110 = vmatmul.msk.f32.vlgmr.msra.gmra.mxu0 %vm56_vm0, %v50_v4 }
  0x90   :  { %v77_v6 = vpop.f32.mrf.mxu0 }
  0x91   :  { %v90_v7 = vadd.f32 %v116_v5, %v77_v6 }
  0x93   :  { %91 = vst [vmem:[#allocation8] sm:$0xff] %v90_v7 }
  0x94   :  { %102 = dma.vmem_to_hbm [thread:$0]  %s98_s25, 128, %s100_s28, [#allocation5]  }
  0x95   :  { %193 = dma.done.wait [#allocation5], 128  }
  0x96   :  { %194 = vsyncadd [#allocation5], 4294967168 }
  0x97   :  { %107 = vsyncpa [#allocation4], 1 }
  0x98   :  { %108 = vsyncpa [#allocation7], 1 }
  0x99   :  { %109 = vsyncpa [#allocation5], 1 }

</bundles_post_ra>
